<compile_context>
chip_gen: v7x
topology: tpu7x:2x2x1
jax: 0.10.0
libtpu: 0.0.40
codegen_flags: <defaults>
</compile_context>

<pallas_src>
import functools

import jax
import jax.numpy as jnp
from jax.experimental import pallas as pl
from jax.experimental.pallas import tpu as pltpu

# ---- small synthetic ViT-ish config (vit_small has E=384/H=6; shrunk here) ----
PATCH = 16
EMBED = 32
HEADS = 4
HEAD_DIM = EMBED // HEADS
LN_EPS = 1e-6
CS_EPS = 1e-12      # guards only the exactly-zero (padded) rows in the cs path


def _round_up(x, m):
    return (x + m - 1) // m * m


# ------------------------------ fused Pallas kernel ------------------------------
def _dino_fused_kernel(p1_ref, p2_ref, base_ref, pw_ref, g_ref, b_ref,
                       wk_ref, bk_ref, o_ref, *, loss_type, bt, t_pad, n_real):
    """One grid step == `bt` batch elements, both views processed end-to-end.

    p*_ref : (bt, t_pad, CPP) padded patch rows (row 0 = cls placeholder,
             rows >= n_real = alignment padding; both all-zero).
    base   : (t_pad, E) additive term = [cls+pos0 ; patch_b+pos_i ; 0-pad].
    pw     : (CPP, E) bf16 patch-embed weight.
    g, b   : (1, E) f32 LayerNorm scale / shift.
    wk, bk : mse -> (E, E) bf16 / (1, E) f32
             cs  -> (HEADS, E, HEAD_DIM) bf16 / (HEADS, 1, HEAD_DIM) f32
    o_ref  : (1, 1, 1) per-step partial loss sum (finalized outside).
    """
    cpp = p1_ref.shape[-1]

    # Invariant operands loaded once per grid step (not per image / head).
    base = base_ref[...]                       # (t_pad, E)
    gamma = g_ref[...]                         # (1, E)
    beta = b_ref[...]                          # (1, E)
    pw = pw_ref[...]                           # (CPP, E) bf16

    def ln_tokens(p_ref):
        # One (bt*t_pad, CPP) @ (CPP, E) bf16 MXU matmul for all bt images.
        p = p_ref[...].reshape(bt * t_pad, cpp).astype(jnp.bfloat16)
        emb = jnp.dot(p, pw, preferred_element_type=jnp.float32)
        x = emb.reshape(bt, t_pad, EMBED) + base       # broadcast over bt
        mu = jnp.mean(x, axis=-1, keepdims=True)
        xm = x - mu                                    # reused (one less pass)
        var = jnp.mean(xm * xm, axis=-1, keepdims=True)
        xn = xm * jax.lax.rsqrt(var + LN_EPS) * gamma + beta
        return xn.reshape(bt * t_pad, EMBED).astype(jnp.bfloat16)

    xn1 = ln_tokens(p1_ref)
    xn2 = ln_tokens(p2_ref)

    if loss_type == "mse":
        wk = wk_ref[...]                       # (E, E) bf16
        bk = bk_ref[...]                       # (1, E) f32
        k1 = jnp.dot(xn1, wk, preferred_element_type=jnp.float32) + bk
        k2 = jnp.dot(xn2, wk, preferred_element_type=jnp.float32) + bk
        d = k1 - k2      # padded rows identical in both views -> contribute 0
        partial = jnp.sum(d * d)   # mean divisor + /pixes applied outside
    else:
        # Padded rows have equal-but-nonzero keys; zero them out so they drop
        # out of the Gram difference entirely.
        rows = jax.lax.broadcasted_iota(jnp.int32, (t_pad, 1), 0)
        tok_mask = (rows < n_real).astype(jnp.float32)          # (t_pad, 1)
        dn = (((1,), (1,)), ((), ()))    # contract last dims (k @ k^T, no .T)
        partial = jnp.zeros((), jnp.float32)
        for h in range(HEADS):           # heads: free leading-dim weight slices
            wkh = wk_ref[h]              # (E, HEAD_DIM) bf16
            bkh = bk_ref[h]              # (1, HEAD_DIM) f32
            k1h = (jnp.dot(xn1, wkh, preferred_element_type=jnp.float32) + bkh
                   ).reshape(bt, t_pad, HEAD_DIM) * tok_mask
            k2h = (jnp.dot(xn2, wkh, preferred_element_type=jnp.float32) + bkh
                   ).reshape(bt, t_pad, HEAD_DIM) * tok_mask
            # Row norms for all bt*t_pad rows in one reduce per image; the eps
            # clamp only fires on padded (exactly zero) rows, whose normalized
            # rows stay 0 and thus contribute 0 to c1 - c2.
            inv1 = jax.lax.rsqrt(jnp.maximum(
                jnp.sum(k1h * k1h, axis=-1, keepdims=True), CS_EPS))
            inv2 = jax.lax.rsqrt(jnp.maximum(
                jnp.sum(k2h * k2h, axis=-1, keepdims=True), CS_EPS))
            kn1 = k1h * inv1
            kn2 = k2h * inv2
            for bi in range(bt):         # static unroll; Grams are per (b, h)
                c1 = jax.lax.dot_general(kn1[bi], kn1[bi], dn,
                                         preferred_element_type=jnp.float32)
                c2 = jax.lax.dot_general(kn2[bi], kn2[bi], dn,
                                         preferred_element_type=jnp.float32)
                d = c1 - c2              # the "1 -" offsets cancel in the diff
                partial = partial + jnp.sum(d * d)

    o_ref[...] = partial.reshape(1, 1, 1)


# ------------------------------ glue (plain JAX) ------------------------------
def _to_padded_patch_tokens(img, t_pad):
    """NCHW -> (B, t_pad, C*P*P); row 0 (cls) and rows >= 1+hp*wp stay zero."""
    B, C, H, W = img.shape
    hp, wp = H // PATCH, W // PATCH
    x = img.astype(jnp.float32).reshape(B, C, hp, PATCH, wp, PATCH)
    x = x.transpose(0, 2, 4, 1, 3, 5).reshape(B, hp * wp, C * PATCH * PATCH)
    # TODO(synk): at real ViT scale fold this relayout + zero pad into the
    # pallas_call input DMA instead of materializing it in HBM.
    out = jnp.zeros((B, t_pad, x.shape[-1]), jnp.float32)
    return jax.lax.dynamic_update_slice(out, x, (0, 1, 0))


def _token_base(params, n_real, t_pad):
    """(t_pad,E): row0 = cls+pos0; 1..n_real-1 = patch_b+pos; pad rows = 0."""
    cls_row = params["cls"].reshape(1, EMBED) + params["pos"][0, 0:1]
    patch_rows = params["patch_b"] + params["pos"][0, 1:n_real]
    pad = jnp.zeros((t_pad - n_real, EMBED), jnp.float32)
    return jnp.concatenate([cls_row, patch_rows, pad], axis=0)


def init_params(key, img_hw, channels=3):
    h, w = img_hw
    n_tok = (h // PATCH) * (w // PATCH) + 1              # +1 cls token
    ks = jax.random.split(key, 4)
    cpp = channels * PATCH * PATCH
    return {
        "patch_w": 0.02 * jax.random.normal(ks[0], (cpp, EMBED), jnp.float32),
        "patch_b": jnp.zeros((1, EMBED), jnp.float32),
        "cls": 0.02 * jax.random.normal(ks[1], (1, 1, EMBED), jnp.float32),
        "pos": 0.02 * jax.random.normal(ks[2], (1, n_tok, EMBED), jnp.float32),
        "ln_g": jnp.ones((1, EMBED), jnp.float32),
        "ln_b": jnp.zeros((1, EMBED), jnp.float32),
        "wk": 0.02 * jax.random.normal(ks[3], (EMBED, EMBED), jnp.float32),
        "bk": jnp.zeros((1, EMBED), jnp.float32),
    }


def _pick_bt(batch):
    # v7x wants >=2 (even) grid steps so both TensorCores get work; v6e/v5e
    # prefer few big steps -> 2 steps satisfies both here.  At real ViT scale
    # cap bt so 2 views x 2 pipeline buffers x (bt, T_pad, CPP) f32 tiles fit
    # the generation's scoped-VMEM budget (raise vmem_limit_bytes if needed).
    return batch // 2 if (batch % 2 == 0 and batch >= 2) else batch


def dino_loss(img1, img2, params, loss_type="mse"):
    # TODO(synk): the real module runs the full pretrained DINO ViT-small
    # (12 transformer blocks, torch.hub weights); this deterministic stand-in
    # reproduces only the patch-embed + layernorm + key-projection structure.
    b, c, h, w = img1.shape
    pixes = b * h * w
    n_real = (h // PATCH) * (w // PATCH) + 1
    t_pad = _round_up(n_real, 8)
    bt = _pick_bt(b)
    n_steps = b // bt

    p1 = _to_padded_patch_tokens(img1, t_pad)            # (B, t_pad, CPP)
    p2 = _to_padded_patch_tokens(img2, t_pad)
    cpp = p1.shape[-1]
    base = _token_base(params, n_real, t_pad)            # (t_pad, E)

    pw = params["patch_w"].astype(jnp.bfloat16)          # bf16 MXU operands
    if loss_type == "mse":
        wk = params["wk"].astype(jnp.bfloat16)                        # (E, E)
        bk = params["bk"]                                             # (1, E)
        wk_spec = pl.BlockSpec((EMBED, EMBED), lambda i: (0, 0))
        bk_spec = pl.BlockSpec((1, EMBED), lambda i: (0, 0))
    else:
        # Heads on the leading axis: per-head weight slice is free addressing.
        wk = (params["wk"].reshape(EMBED, HEADS, HEAD_DIM)
              .transpose(1, 0, 2).astype(jnp.bfloat16))               # (H,E,D)
        bk = params["bk"].reshape(HEADS, 1, HEAD_DIM)                 # (H,1,D)
        wk_spec = pl.BlockSpec((HEADS, EMBED, HEAD_DIM), lambda i: (0, 0, 0))
        bk_spec = pl.BlockSpec((HEADS, 1, HEAD_DIM), lambda i: (0, 0, 0))

    kernel = functools.partial(_dino_fused_kernel, loss_type=loss_type,
                               bt=bt, t_pad=t_pad, n_real=n_real)
    partials = pl.pallas_call(
        kernel,
        out_shape=jax.ShapeDtypeStruct((n_steps, 1, 1), jnp.float32),
        grid=(n_steps,),
        in_specs=[
            pl.BlockSpec((bt, t_pad, cpp), lambda i: (i, 0, 0)),
            pl.BlockSpec((bt, t_pad, cpp), lambda i: (i, 0, 0)),
            pl.BlockSpec((t_pad, EMBED), lambda i: (0, 0)),
            pl.BlockSpec((cpp, EMBED), lambda i: (0, 0)),
            pl.BlockSpec((1, EMBED), lambda i: (0, 0)),
            pl.BlockSpec((1, EMBED), lambda i: (0, 0)),
            wk_spec,
            bk_spec,
        ],
        out_specs=pl.BlockSpec((1, 1, 1), lambda i: (i, 0, 0)),
        compiler_params=pltpu.CompilerParams(
            dimension_semantics=("parallel",)),   # v7x: steps split across TCs
    )(p1, p2, base, pw, params["ln_g"], params["ln_b"], wk, bk)

    total = jnp.sum(partials)                     # tiny finalize outside kernel
    if loss_type == "mse":
        loss = total / (b * n_real * EMBED)       # F.mse_loss 'mean' over elems
    else:
        loss = jnp.sqrt(total)                    # Frobenius norm
    return loss / pixes


# ------------------------------ reference (pure jnp) ------------------------------
def _ref_keys(img, params):
    B, C, H, W = img.shape
    hp, wp = H // PATCH, W // PATCH
    p = (img.astype(jnp.float32).reshape(B, C, hp, PATCH, wp, PATCH)
         .transpose(0, 2, 4, 1, 3, 5).reshape(B, hp * wp, C * PATCH * PATCH))
    # Matmul operands in bf16 (f32 accumulate) to match the kernel's MXU path.
    tok = jnp.einsum("bnc,ce->bne", p.astype(jnp.bfloat16),
                     params["patch_w"].astype(jnp.bfloat16),
                     preferred_element_type=jnp.float32) + params["patch_b"]
    cls = jnp.broadcast_to(params["cls"], (B, 1, EMBED))
    xx = jnp.concatenate([cls, tok], axis=1) + params["pos"]
    mu = xx.mean(-1, keepdims=True)
    xm = xx - mu
    var = (xm * xm).mean(-1, keepdims=True)
    xn = xm / jnp.sqrt(var + LN_EPS) * params["ln_g"] + params["ln_b"]
    k = jnp.einsum("bte,ef->btf", xn.astype(jnp.bfloat16),
                   params["wk"].astype(jnp.bfloat16),
                   preferred_element_type=jnp.float32) + params["bk"]
    T = hp * wp + 1
    return k.reshape(B, T, HEADS, HEAD_DIM).transpose(0, 2, 1, 3)   # (B,H,T,D)


def ref_dino_loss(img1, img2, params, loss_type):
    hi = jax.lax.Precision.HIGHEST
    b, c, h, w = img1.shape
    pixes = b * h * w
    k1 = _ref_keys(img1, params)
    k2 = _ref_keys(img2, params)
    if loss_type == "mse":
        return jnp.mean((k1 - k2) ** 2) / pixes

    def sim(k):                       # exact PyTorch formula: no eps clamp
        kk = jnp.einsum("bhnd,bhmd->bhnm", k, k, precision=hi)
        nm = jnp.linalg.norm(k, axis=-1, keepdims=True)
        return 1.0 - kk / (nm * jnp.swapaxes(nm, -1, -2))

    return jnp.sqrt(jnp.sum((sim(k1) - sim(k2)) ** 2)) / pixes


if __name__ == "__main__":
    key = jax.random.PRNGKey(0)
    k_img1, k_img2, k_par = jax.random.split(key, 3)

    B, C, H, W = 4, 3, 32, 32                   # small RGB NCHW images, 2x2 patches
    img1 = jax.random.normal(k_img1, (B, C, H, W), jnp.float32)
    img2 = jax.random.normal(k_img2, (B, C, H, W), jnp.float32)
    params = init_params(k_par, (H, W), channels=C)

    loss_fn = jax.jit(dino_loss, static_argnames=("loss_type",))
    loss_mse = loss_fn(img1, img2, params, loss_type="mse")
    loss_cs = loss_fn(img1, img2, params, loss_type="cs")
    jax.block_until_ready((loss_mse, loss_cs))

    ref_mse = ref_dino_loss(img1, img2, params, "mse")
    ref_cs = ref_dino_loss(img1, img2, params, "cs")
    # bf16 MXU operands are mirrored in the reference einsums, so residual
    # differences are accumulation-order / rsqrt-level only.
    assert jnp.allclose(loss_mse, ref_mse, rtol=2e-2, atol=1e-10), (loss_mse, ref_mse)
    assert jnp.allclose(loss_cs, ref_cs, rtol=2e-2, atol=1e-9), (loss_cs, ref_cs)

    print("KERNEL_OK")
</pallas_src>

<mosaic_0001>
module attributes {stable_mosaic.version = 11 : i64} {
  func.func @_dino_fused_kernel(%arg0: i32, %arg1: memref<2x8x768xf32, #tpu.memory_space<vmem>>, %arg2: memref<2x8x768xf32, #tpu.memory_space<vmem>>, %arg3: memref<8x32xf32, #tpu.memory_space<vmem>>, %arg4: memref<768x32xbf16, #tpu.memory_space<vmem>>, %arg5: memref<1x32xf32, #tpu.memory_space<vmem>>, %arg6: memref<1x32xf32, #tpu.memory_space<vmem>>, %arg7: memref<32x32xbf16, #tpu.memory_space<vmem>>, %arg8: memref<1x32xf32, #tpu.memory_space<vmem>>, %arg9: memref<1x1x1xf32, #tpu.memory_space<vmem>>) attributes {dimension_semantics = [#tpu.dimension_semantics<parallel>], iteration_bounds = array<i64: 2>, scalar_prefetch = 0 : i64, scratch_operands = 0 : i64, tpu.core_type = #tpu.core_type<tc>, window_params = [{transform_indices = @transform_0, window_bounds = array<i64: 2, 8, 768>}, {transform_indices = @transform_1, window_bounds = array<i64: 2, 8, 768>}, {pipeline_mode = #tpu.pipeline_mode<synchronous>, transform_indices = @transform_2, window_bounds = array<i64: 8, 32>}, {pipeline_mode = #tpu.pipeline_mode<synchronous>, transform_indices = @transform_3, window_bounds = array<i64: 768, 32>}, {pipeline_mode = #tpu.pipeline_mode<synchronous>, transform_indices = @transform_4, window_bounds = array<i64: 1, 32>}, {pipeline_mode = #tpu.pipeline_mode<synchronous>, transform_indices = @transform_5, window_bounds = array<i64: 1, 32>}, {pipeline_mode = #tpu.pipeline_mode<synchronous>, transform_indices = @transform_6, window_bounds = array<i64: 32, 32>}, {pipeline_mode = #tpu.pipeline_mode<synchronous>, transform_indices = @transform_7, window_bounds = array<i64: 1, 32>}, {transform_indices = @transform_8, window_bounds = array<i64: 1, 1, 1>}]} {
    %c0 = arith.constant 0 : index
    %c0_0 = arith.constant 0 : index
    %0 = vector.load %arg3[%c0, %c0_0] : memref<8x32xf32, #tpu.memory_space<vmem>>, vector<8x32xf32>
    %c0_1 = arith.constant 0 : index
    %c0_2 = arith.constant 0 : index
    %1 = vector.load %arg5[%c0_1, %c0_2] : memref<1x32xf32, #tpu.memory_space<vmem>>, vector<1x32xf32>
    %c0_3 = arith.constant 0 : index
    %c0_4 = arith.constant 0 : index
    %2 = vector.load %arg6[%c0_3, %c0_4] : memref<1x32xf32, #tpu.memory_space<vmem>>, vector<1x32xf32>
    %c0_5 = arith.constant 0 : index
    %c0_6 = arith.constant 0 : index
    %3 = vector.load %arg4[%c0_5, %c0_6] : memref<768x32xbf16, #tpu.memory_space<vmem>>, vector<768x32xbf16>
    %c0_7 = arith.constant 0 : index
    %c0_8 = arith.constant 0 : index
    %c0_9 = arith.constant 0 : index
    %4 = vector.load %arg1[%c0_7, %c0_8, %c0_9] : memref<2x8x768xf32, #tpu.memory_space<vmem>>, vector<2x8x768xf32>
    %5 = vector.shape_cast %4 : vector<2x8x768xf32> to vector<16x768xf32>
    %6 = arith.truncf %5 : vector<16x768xf32> to vector<16x768xbf16>
    %cst = arith.constant dense<0.000000e+00> : vector<16x32xf32>
    %7 = tpu.matmul %6, %3, %cst {dimension_numbers = #tpu.dot_dimension_numbers<[1], [0], [0], [1], [0, 0, 1, 1], [], []>} : vector<16x768xbf16>, vector<768x32xbf16>, vector<16x32xf32> -> vector<16x32xf32>
    %8 = vector.shape_cast %7 : vector<16x32xf32> to vector<2x8x32xf32>
    %9 = vector.shape_cast %0 : vector<8x32xf32> to vector<1x8x32xf32>
    %10 = vector.broadcast %9 : vector<1x8x32xf32> to vector<2x8x32xf32>
    %11 = arith.addf %8, %10 : vector<2x8x32xf32>
    %cst_10 = arith.constant dense<0.000000e+00> : vector<2x8xf32>
    %12 = vector.multi_reduction <add>, %11, %cst_10 [2] : vector<2x8x32xf32> to vector<2x8xf32>
    %13 = vector.shape_cast %12 : vector<2x8xf32> to vector<2x8x1xf32>
    %cst_11 = arith.constant 3.200000e+01 : f32
    %14 = vector.broadcast %cst_11 : f32 to vector<2x8x1xf32>
    %15 = arith.divf %13, %14 : vector<2x8x1xf32>
    %16 = vector.broadcast %15 : vector<2x8x1xf32> to vector<2x8x32xf32>
    %17 = arith.subf %11, %16 : vector<2x8x32xf32>
    %18 = arith.mulf %17, %17 : vector<2x8x32xf32>
    %cst_12 = arith.constant dense<0.000000e+00> : vector<2x8xf32>
    %19 = vector.multi_reduction <add>, %18, %cst_12 [2] : vector<2x8x32xf32> to vector<2x8xf32>
    %20 = vector.shape_cast %19 : vector<2x8xf32> to vector<2x8x1xf32>
    %cst_13 = arith.constant 3.200000e+01 : f32
    %21 = vector.broadcast %cst_13 : f32 to vector<2x8x1xf32>
    %22 = arith.divf %20, %21 : vector<2x8x1xf32>
    %cst_14 = arith.constant 9.99999997E-7 : f32
    %23 = vector.broadcast %cst_14 : f32 to vector<2x8x1xf32>
    %24 = arith.addf %22, %23 : vector<2x8x1xf32>
    %25 = math.rsqrt %24 : vector<2x8x1xf32>
    %26 = vector.broadcast %25 : vector<2x8x1xf32> to vector<2x8x32xf32>
    %27 = arith.mulf %17, %26 : vector<2x8x32xf32>
    %28 = vector.shape_cast %1 : vector<1x32xf32> to vector<1x1x32xf32>
    %29 = vector.broadcast %28 : vector<1x1x32xf32> to vector<2x8x32xf32>
    %30 = arith.mulf %27, %29 : vector<2x8x32xf32>
    %31 = vector.shape_cast %2 : vector<1x32xf32> to vector<1x1x32xf32>
    %32 = vector.broadcast %31 : vector<1x1x32xf32> to vector<2x8x32xf32>
    %33 = arith.addf %30, %32 : vector<2x8x32xf32>
    %34 = vector.shape_cast %33 : vector<2x8x32xf32> to vector<16x32xf32>
    %35 = arith.truncf %34 : vector<16x32xf32> to vector<16x32xbf16>
    %c0_15 = arith.constant 0 : index
    %c0_16 = arith.constant 0 : index
    %c0_17 = arith.constant 0 : index
    %36 = vector.load %arg2[%c0_15, %c0_16, %c0_17] : memref<2x8x768xf32, #tpu.memory_space<vmem>>, vector<2x8x768xf32>
    %37 = vector.shape_cast %36 : vector<2x8x768xf32> to vector<16x768xf32>
    %38 = arith.truncf %37 : vector<16x768xf32> to vector<16x768xbf16>
    %cst_18 = arith.constant dense<0.000000e+00> : vector<16x32xf32>
    %39 = tpu.matmul %38, %3, %cst_18 {dimension_numbers = #tpu.dot_dimension_numbers<[1], [0], [0], [1], [0, 0, 1, 1], [], []>} : vector<16x768xbf16>, vector<768x32xbf16>, vector<16x32xf32> -> vector<16x32xf32>
    %40 = vector.shape_cast %39 : vector<16x32xf32> to vector<2x8x32xf32>
    %41 = vector.shape_cast %0 : vector<8x32xf32> to vector<1x8x32xf32>
    %42 = vector.broadcast %41 : vector<1x8x32xf32> to vector<2x8x32xf32>
    %43 = arith.addf %40, %42 : vector<2x8x32xf32>
    %cst_19 = arith.constant dense<0.000000e+00> : vector<2x8xf32>
    %44 = vector.multi_reduction <add>, %43, %cst_19 [2] : vector<2x8x32xf32> to vector<2x8xf32>
    %45 = vector.shape_cast %44 : vector<2x8xf32> to vector<2x8x1xf32>
    %cst_20 = arith.constant 3.200000e+01 : f32
    %46 = vector.broadcast %cst_20 : f32 to vector<2x8x1xf32>
    %47 = arith.divf %45, %46 : vector<2x8x1xf32>
    %48 = vector.broadcast %47 : vector<2x8x1xf32> to vector<2x8x32xf32>
    %49 = arith.subf %43, %48 : vector<2x8x32xf32>
    %50 = arith.mulf %49, %49 : vector<2x8x32xf32>
    %cst_21 = arith.constant dense<0.000000e+00> : vector<2x8xf32>
    %51 = vector.multi_reduction <add>, %50, %cst_21 [2] : vector<2x8x32xf32> to vector<2x8xf32>
    %52 = vector.shape_cast %51 : vector<2x8xf32> to vector<2x8x1xf32>
    %cst_22 = arith.constant 3.200000e+01 : f32
    %53 = vector.broadcast %cst_22 : f32 to vector<2x8x1xf32>
    %54 = arith.divf %52, %53 : vector<2x8x1xf32>
    %cst_23 = arith.constant 9.99999997E-7 : f32
    %55 = vector.broadcast %cst_23 : f32 to vector<2x8x1xf32>
    %56 = arith.addf %54, %55 : vector<2x8x1xf32>
    %57 = math.rsqrt %56 : vector<2x8x1xf32>
    %58 = vector.broadcast %57 : vector<2x8x1xf32> to vector<2x8x32xf32>
    %59 = arith.mulf %49, %58 : vector<2x8x32xf32>
    %60 = vector.shape_cast %1 : vector<1x32xf32> to vector<1x1x32xf32>
    %61 = vector.broadcast %60 : vector<1x1x32xf32> to vector<2x8x32xf32>
    %62 = arith.mulf %59, %61 : vector<2x8x32xf32>
    %63 = vector.shape_cast %2 : vector<1x32xf32> to vector<1x1x32xf32>
    %64 = vector.broadcast %63 : vector<1x1x32xf32> to vector<2x8x32xf32>
    %65 = arith.addf %62, %64 : vector<2x8x32xf32>
    %66 = vector.shape_cast %65 : vector<2x8x32xf32> to vector<16x32xf32>
    %67 = arith.truncf %66 : vector<16x32xf32> to vector<16x32xbf16>
    %c0_24 = arith.constant 0 : index
    %c0_25 = arith.constant 0 : index
    %68 = vector.load %arg7[%c0_24, %c0_25] : memref<32x32xbf16, #tpu.memory_space<vmem>>, vector<32x32xbf16>
    %c0_26 = arith.constant 0 : index
    %c0_27 = arith.constant 0 : index
    %69 = vector.load %arg8[%c0_26, %c0_27] : memref<1x32xf32, #tpu.memory_space<vmem>>, vector<1x32xf32>
    %cst_28 = arith.constant dense<0.000000e+00> : vector<16x32xf32>
    %70 = tpu.matmul %35, %68, %cst_28 {dimension_numbers = #tpu.dot_dimension_numbers<[1], [0], [0], [1], [0, 0, 1, 1], [], []>} : vector<16x32xbf16>, vector<32x32xbf16>, vector<16x32xf32> -> vector<16x32xf32>
    %71 = vector.broadcast %69 : vector<1x32xf32> to vector<16x32xf32>
    %72 = arith.addf %70, %71 : vector<16x32xf32>
    %cst_29 = arith.constant dense<0.000000e+00> : vector<16x32xf32>
    %73 = tpu.matmul %67, %68, %cst_29 {dimension_numbers = #tpu.dot_dimension_numbers<[1], [0], [0], [1], [0, 0, 1, 1], [], []>} : vector<16x32xbf16>, vector<32x32xbf16>, vector<16x32xf32> -> vector<16x32xf32>
    %74 = vector.broadcast %69 : vector<1x32xf32> to vector<16x32xf32>
    %75 = arith.addf %73, %74 : vector<16x32xf32>
    %76 = arith.subf %72, %75 : vector<16x32xf32>
    %77 = arith.mulf %76, %76 : vector<16x32xf32>
    %78 = vector.shape_cast %77 : vector<16x32xf32> to vector<1x16x32xf32>
    %cst_30 = arith.constant dense<0.000000e+00> : vector<1xf32>
    %79 = vector.multi_reduction <add>, %78, %cst_30 [1, 2] : vector<1x16x32xf32> to vector<1xf32>
    %80 = vector.shape_cast %79 : vector<1xf32> to vector<1x1x1xf32>
    %81 = vector.extract %80[0, 0, 0] : f32 from vector<1x1x1xf32>
    %82 = vector.broadcast %81 : f32 to vector<1x1x1xf32>
    %c0_31 = arith.constant 0 : index
    %c0_32 = arith.constant 0 : index
    %c0_33 = arith.constant 0 : index
    %83 = vector.load %arg9[%c0_31, %c0_32, %c0_33] : memref<1x1x1xf32, #tpu.memory_space<vmem>>, vector<1x1x1xf32>
    tpu.vector_store %arg9[%c0_31, %c0_32, %c0_33], %82 {strides = array<i32>} : memref<1x1x1xf32, #tpu.memory_space<vmem>>, vector<1x1x1xf32>,
    return
  }
  func.func @transform_0(%arg0: i32) -> (i32, i32, i32) {
    %c0_i32 = arith.constant 0 : i32
    %c0_i32_0 = arith.constant 0 : i32
    %c0_i32_1 = arith.constant 0 : i32
    return %arg0, %c0_i32, %c0_i32_0 : i32, i32, i32
  }
  func.func @transform_1(%arg0: i32) -> (i32, i32, i32) {
    %c0_i32 = arith.constant 0 : i32
    %c0_i32_0 = arith.constant 0 : i32
    %c0_i32_1 = arith.constant 0 : i32
    return %arg0, %c0_i32, %c0_i32_0 : i32, i32, i32
  }
  func.func @transform_2(%arg0: i32) -> (i32, i32) {
    %c0_i32 = arith.constant 0 : i32
    %c0_i32_0 = arith.constant 0 : i32
    %c0_i32_1 = arith.constant 0 : i32
    return %c0_i32, %c0_i32_0 : i32, i32
  }
  func.func @transform_3(%arg0: i32) -> (i32, i32) {
    %c0_i32 = arith.constant 0 : i32
    %c0_i32_0 = arith.constant 0 : i32
    %c0_i32_1 = arith.constant 0 : i32
    return %c0_i32, %c0_i32_0 : i32, i32
  }
  func.func @transform_4(%arg0: i32) -> (i32, i32) {
    %c0_i32 = arith.constant 0 : i32
    %c0_i32_0 = arith.constant 0 : i32
    %c0_i32_1 = arith.constant 0 : i32
    return %c0_i32, %c0_i32_0 : i32, i32
  }
  func.func @transform_5(%arg0: i32) -> (i32, i32) {
    %c0_i32 = arith.constant 0 : i32
    %c0_i32_0 = arith.constant 0 : i32
    %c0_i32_1 = arith.constant 0 : i32
    return %c0_i32, %c0_i32_0 : i32, i32
  }
  func.func @transform_6(%arg0: i32) -> (i32, i32) {
    %c0_i32 = arith.constant 0 : i32
    %c0_i32_0 = arith.constant 0 : i32
    %c0_i32_1 = arith.constant 0 : i32
    return %c0_i32, %c0_i32_0 : i32, i32
  }
  func.func @transform_7(%arg0: i32) -> (i32, i32) {
    %c0_i32 = arith.constant 0 : i32
    %c0_i32_0 = arith.constant 0 : i32
    %c0_i32_1 = arith.constant 0 : i32
    return %c0_i32, %c0_i32_0 : i32, i32
  }
  func.func @transform_8(%arg0: i32) -> (i32, i32, i32) {
    %c0_i32 = arith.constant 0 : i32
    %c0_i32_0 = arith.constant 0 : i32
    %c0_i32_1 = arith.constant 0 : i32
    return %arg0, %c0_i32, %c0_i32_0 : i32, i32, i32
  }
}

</mosaic_0001>

<bundles_post_ra>
// kernel: dino_loss.1
= control target key start
LH: loop header
LB: loop body
LE: loop exit
PB: predicated region body
PF: predicated region fallthrough
CT: control target
= control target key end

     0   :  { %s1617_s27 = smov 0   ;;  %s2023_s0 = inlined_call_operand.vmem [shape: f32[4,8,768], index: 0, kind: input, shape index: {}]   ;;  %s2024_s1 = inlined_call_operand.vmem [shape: f32[4,8,768], index: 1, kind: input, shape index: {}]   ;;  %s2025_s2 = inlined_call_operand.vmem [shape: f32[8,32], index: 2, kind: input, shape index: {}]   ;;  %s2026_s3 = inlined_call_operand.vmem [shape: bf16[768,32], index: 3, kind: input, shape index: {}]   ;;  %s2027_s4 = inlined_call_operand.vmem [shape: f32[1,32], index: 4, kind: input, shape index: {}]   ;;  %s2028_s5 = inlined_call_operand.vmem [shape: f32[1,32], index: 5, kind: input, shape index: {}]   ;;  %s2029_s6 = inlined_call_operand.vmem [shape: bf16[32,32], index: 6, kind: input, shape index: {}]   ;;  %s2030_s7 = inlined_call_operand.vmem [shape: f32[1,32], index: 7, kind: input, shape index: {}]   ;;  %s2031_s8 = inlined_call_operand.vmem [shape: f32[2,1,1], index: 8, kind: output, shape index: {}]  }
   0x1 LB: > { %s1623_s28 = sadd.s32 4294967295, %s1568_s27   ;;  %p1275_p0 = scmp.ge.s32.totalorder %s1568_s27, 1  ;;  %s1568_s27 = sphi %s1617_s27, %s18_s27  }
   0x2   : > { %p276_p1 = scmp.lt.s32.totalorder %s1568_s27, 3 }
   0x4   : > { %p277_p2 = pnand %p1275_p0, %p276_p1 }
   0x5   : > { %v1630_v0 = vld [vmem:[%s2026_s3 + $0x40] sm:$0xff] (!%p277_p2)   ;;  %v1653_v4 = vld [vmem:[%s2026_s3 + $0x48] sm:$0xff] (!%p277_p2)   ;;  %v1677_v8 = vld [vmem:[%s2026_s3 + $0x50] sm:$0xff] (!%p277_p2)   ;;  %s1276_s17 = sshll.u32 (!%p277_p2), %s1623_s28, 1  ;;  %vm863_vm0 = vcmask (!%p277_p2), 261120   ;;  %vm1571_vm1 = vmmov (!%p277_p2), 0  }
   0x6   : > { %280 = sbr.rel (%p277_p2) target bundleno = 1072 (0x430), region = 52  ;;  %v1635_v1 = vld [vmem:[%s2026_s3 + $0xc0] sm:$0xff] (!%p277_p2)   ;;  %1337 = vmatprep.subr.bf16.mxu0 (!%p277_p2), %v1630_v0  ;;  %v1659_v5 = vld [vmem:[%s2026_s3 + $0xc8] sm:$0xff] (!%p277_p2)   ;;  %v1683_v9 = vld [vmem:[%s2026_s3 + $0xd0] sm:$0xff] (!%p277_p2)   ;;  %p316_p3 = scmp.lt.s32.totalorder (!%p277_p2), %s1276_s17, 3  ;;  %vm1210_vm2 = vcmask (!%p277_p2), 0  }
   0x7   : > { %v1641_v2 = vld [vmem:[%s2026_s3] sm:$0xff] (!%p277_p2)   ;;  %1359 = vmatprep.subr.bf16.mxu1 (!%p277_p2), %v1635_v1  ;;  %v1665_v6 = vld [vmem:[%s2026_s3 + $0x8] sm:$0xff] (!%p277_p2)   ;;  %v1689_v10 = vld [vmem:[%s2026_s3 + $0x10] sm:$0xff] (!%p277_p2)   ;;  %p329_p4 = scmp.lt.s32.totalorder (!%p277_p2), %s1623_s28, 1 }
   0x8   : > { %v1647_v3 = vld [vmem:[%s2026_s3 + $0x80] sm:$0xff] (!%p277_p2)   ;;  %1338 = vmatpush3.bf16.msra.mxu0 (!%p277_p2), %v1641_v2  ;;  %v1671_v7 = vld [vmem:[%s2026_s3 + $0x88] sm:$0xff] (!%p277_p2)   ;;  %v1695_v11 = vld [vmem:[%s2026_s3 + $0x90] sm:$0xff] (!%p277_p2)  }
   0x9   : > { %1360 = vmatpush3.bf16.msra.mxu1 (!%p277_p2), %v1647_v3  ;;  %1339 = vmatprep.subr.bf16.mxu0 (!%p277_p2), %v1653_v4  ;;  %v1701_v12 = vld [vmem:[%s2026_s3 + $0x58] sm:$0xff] (!%p277_p2)   ;;  %v1726_v16 = vld [vmem:[%s2026_s3 + $0x60] sm:$0xff] (!%p277_p2)   ;;  %v1750_v20 = vld [vmem:[%s2026_s3 + $0x68] sm:$0xff] (!%p277_p2)  }
   0xa   : > { %1361 = vmatprep.subr.bf16.mxu1 (!%p277_p2), %v1659_v5  ;;  %v1707_v13 = vld [vmem:[%s2026_s3 + $0xd8] sm:$0xff] (!%p277_p2)   ;;  %v1732_v17 = vld [vmem:[%s2026_s3 + $0xe0] sm:$0xff] (!%p277_p2)   ;;  %v1756_v21 = vld [vmem:[%s2026_s3 + $0xe8] sm:$0xff] (!%p277_p2)  }
   0xb   : > { %v1713_v14 = vld [vmem:[%s2026_s3 + $0x18] sm:$0xff] (!%p277_p2)   ;;  %v1738_v18 = vld [vmem:[%s2026_s3 + $0x20] sm:$0xff] (!%p277_p2)   ;;  %v1764_v22 = vld [vmem:[%s2026_s3 + $0x28] sm:$0xff] (!%p277_p2)  }
   0xc   : > { %1340 = vmatpush3.bf16.msra.mxu0 (!%p277_p2), %v1665_v6  ;;  %v1720_v15 = vld [vmem:[%s2026_s3 + $0x98] sm:$0xff] (!%p277_p2)   ;;  %v1744_v19 = vld [vmem:[%s2026_s3 + $0xa0] sm:$0xff] (!%p277_p2)   ;;  %v1770_v23 = vld [vmem:[%s2026_s3 + $0xa8] sm:$0xff] (!%p277_p2)  }
   0xd   : > { %1362 = vmatpush3.bf16.msra.mxu1 %v1671_v7  ;;  %1341 = vmatprep.subr.bf16.mxu0 %v1677_v8  ;;  %s2033_s17 = smov (!%p316_p3, %s1276_s17), 3  ;;  %v1776_v24 = vld [vmem:[%s2026_s3 + $0x70] sm:$0xff]   ;;  %v1801_v28 = vld [vmem:[%s2026_s3 + $0x78] sm:$0xff]   ;;  %v1842_v44 = vld [vmem:[%s2026_s3 + $0x140] sm:$0xff]   ;;  %s2035_s28 = smov (!%p329_p4, %s1623_s28), 1 }
   0xe   : > { %1363 = vmatprep.subr.bf16.mxu1 %v1683_v9  ;;  %v1782_v25 = vld [vmem:[%s2026_s3 + $0xf0] sm:$0xff]   ;;  %s1491_s21 = smul.u32 48, %s2033_s17  ;;  %v1807_v29 = vld [vmem:[%s2026_s3 + $0xf8] sm:$0xff]   ;;  %v1847_v45 = vld [vmem:[%s2026_s3 + $0x100] sm:$0xff]   ;;  %s331_s9 = scalar_lea.vmem %s2031_s8, %s2035_s28 }
   0xf   : > { %v1789_v26 = vld [vmem:[%s2026_s3 + $0x30] sm:$0xff]   ;;  %v1820_v30 = vld [vmem:[%s2026_s3 + $0x38] sm:$0xff]   ;;  %v1853_v46 = vld [vmem:[%s2026_s3 + $0x148] sm:$0xff]  }
  0x10   : > { %1342 = vmatpush3.bf16.msra.mxu0 %v1689_v10  ;;  %v1795_v27 = vld [vmem:[%s2026_s3 + $0xb0] sm:$0xff]   ;;  %s1814_s12 = scalar_lea.vmem %s2023_s0, %s1491_s21  ;;  %v1826_v31 = vld [vmem:[%s2026_s3 + $0xb8] sm:$0xff]   ;;  %v1860_v47 = vld [vmem:[%s2026_s3 + $0x108] sm:$0xff]   ;;  %s1902_s22 = scalar_lea.vmem %s2024_s1, %s1491_s21 }
  0x11   : > { %1364 = vmatpush3.bf16.msra.mxu1 %v1695_v11  ;;  %1343 = vmatprep.subr.bf16.mxu0 %v1701_v12  ;;  %v433_v32 = vld [vmem:[%s1814_s12 + $0x8] sm:$0xff]  ;;  %v439_v33 = vld [vmem:[%s1814_s12 + $0x38] sm:$0xff]  ;;  %v432_v37 = vld [vmem:[%s1814_s12] sm:$0xff] }
  0x12   : > { %1365 = vmatprep.subr.bf16.mxu1 %v1707_v13  ;;  %v435_v34 = vld [vmem:[%s1814_s12 + $0x18] sm:$0xff]  ;;  %v445_v35 = vpack.c.bf16 %v439_v33, %v433_v32  ;;  %v441_v36 = vld [vmem:[%s1814_s12 + $0x48] sm:$0xff]  ;;  %v438_v38 = vld [vmem:[%s1814_s12 + $0x30] sm:$0xff] }
  0x13   : > { %v447_v39 = vpack.c.bf16 %v441_v36, %v435_v34  ;;  %v444_v40 = vpack.c.bf16 %v438_v38, %v432_v37  ;;  %v434_v41 = vld [vmem:[%s1814_s12 + $0x10] sm:$0xff]  ;;  %v440_v42 = vld [vmem:[%s1814_s12 + $0x40] sm:$0xff]  ;;  %v1881_v50 = vld [vmem:[%s2026_s3 + $0x158] sm:$0xff]  }
  0x14   : > { %1344 = vmatpush3.bf16.msra.mxu0 %v1713_v14  ;;  %770 = vmatprep.mubr.bf16.mxu0 %v445_v35  ;;  %v446_v43 = vpack.c.bf16 %v440_v42, %v434_v41  ;;  %v1867_v48 = vld [vmem:[%s2026_s3 + $0x150] sm:$0xff]   ;;  %v1888_v51 = vld [vmem:[%s2026_s3 + $0x118] sm:$0xff]   ;;  %v1895_v52 = vld [vmem:[%s2026_s3 + $0x160] sm:$0xff]  }
  0x15   : > { %1366 = vmatpush3.bf16.msra.mxu1 %v1720_v15  ;;  %1345 = vmatprep.subr.bf16.mxu0 %v1726_v16  ;;  %v1874_v49 = vld [vmem:[%s2026_s3 + $0x110] sm:$0xff]   ;;  %v1907_v53 = vld [vmem:[%s2026_s3 + $0x120] sm:$0xff]   ;;  %v1914_v54 = vld [vmem:[%s2026_s3 + $0x168] sm:$0xff]  }
  0x16   : > { %1367 = vmatprep.subr.bf16.mxu1 %v1732_v17  ;;  %811 = vmatprep.mubr.bf16.mxu1 %v447_v39  ;;  %v437_v55 = vld [vmem:[%s1814_s12 + $0x28] sm:$0xff]  ;;  %v443_v56 = vld [vmem:[%s1814_s12 + $0x58] sm:$0xff]  ;;  %v1548_v62 = vld [vmem:[%s2026_s3 + $0x170] sm:$0xff]  }
  0x17   : > { %v909_v57 = vld [vmem:[%s1902_s22 + $0x8] sm:$0xff]  ;;  %v915_v58 = vld [vmem:[%s1902_s22 + $0x38] sm:$0xff]  ;;  %v449_v59 = vpack.c.bf16 %v443_v56, %v437_v55  ;;  %v1549_v63 = vld [vmem:[%s2026_s3 + $0x130] sm:$0xff]  }
  0x18   : > { %1346 = vmatpush3.bf16.msra.mxu0 %v1738_v18  ;;  %v921_v60 = vpack.c.bf16 %v915_v58, %v909_v57  ;;  %v1547_v61 = vld [vmem:[%s2026_s3 + $0x128] sm:$0xff]  }
  0x19   : > { %1368 = vmatpush3.bf16.msra.mxu1 %v1744_v19  ;;  %1347 = vmatprep.subr.bf16.mxu0 %v1750_v20 }
  0x1a   : > { %1369 = vmatprep.subr.bf16.mxu1 %v1756_v21 }
  0x1c   : > { %1348 = vmatpush3.bf16.msra.mxu0 %v1764_v22 }
  0x1d   : > { %1370 = vmatpush3.bf16.msra.mxu1 %v1770_v23  ;;  %1349 = vmatprep.subr.bf16.mxu0 %v1776_v24 }
  0x1e   : > { %1371 = vmatprep.subr.bf16.mxu1 %v1782_v25 }
  0x20   : > { %1350 = vmatpush3.bf16.msra.mxu0 %v1789_v26 }
  0x21   : > { %1372 = vmatpush3.bf16.msra.mxu1 %v1795_v27  ;;  %1351 = vmatprep.subr.bf16.mxu0 %v1801_v28 }
  0x22   : > { %1373 = vmatprep.subr.bf16.mxu1 %v1807_v29 }
  0x24   : > { %1352 = vmatpush3.bf16.msra.mxu0 %v1820_v30 }
  0x25   : > { %1374 = vmatpush3.bf16.msra.mxu1 %v1826_v31  ;;  %1381 = vmatprep.subr.bf16.mxu0 %v1842_v44 }
  0x26   : > { %1403 = vmatprep.subr.bf16.mxu1 %v1630_v0  ;;  %v1550_v0 = vld [vmem:[%s2026_s3 + $0x178] sm:$0xff]  }
  0x27   : > { %771 = vmatmul.mubr.bf16.vlgmr.msra.gmra.mrb[0].mxu0 %v444_v40 }
  0x28   : > { %812 = vmatmul.mubr.bf16.vlgmr.msra.gmra.mrb[0].mxu1 %v446_v43  ;;  %1382 = vmatpush3.bf16.msra.mxu0 %v1847_v45 }
  0x29   : > { %1404 = vmatpush3.bf16.msra.mxu1 %v1641_v2  ;;  %1383 = vmatprep.subr.bf16.mxu0 %v1853_v46  ;;  %v1551_v2 = vld [vmem:[%s2026_s3 + $0x138] sm:$0xff]  }
  0x2a   : > { %1405 = vmatprep.subr.bf16.mxu1 %v1653_v4  ;;  %852 = vmatprep.mubr.bf16.mxu0 %v449_v59  ;;  %v436_v4 = vld [vmem:[%s1814_s12 + $0x20] sm:$0xff] }
  0x2b   : > { %958 = vmatprep.mubr.bf16.mxu1 %v921_v60 }
  0x2c   : > { %1384 = vmatpush3.bf16.msra.mxu0 %v1860_v47 }
  0x2d   : > { %1406 = vmatpush3.bf16.msra.mxu1 %v1665_v6  ;;  %1385 = vmatprep.subr.bf16.mxu0 %v1867_v48  ;;  %v442_v6 = vld [vmem:[%s1814_s12 + $0x50] sm:$0xff] }
  0x2e   : > { %1407 = vmatprep.subr.bf16.mxu1 %v1677_v8  ;;  %v908_v8 = vld [vmem:[%s1902_s22] sm:$0xff] }
  0x30   : > { %1386 = vmatpush3.bf16.msra.mxu0 %v1874_v49 }
  0x31   : > { %1408 = vmatpush3.bf16.msra.mxu1 %v1689_v10  ;;  %1387 = vmatprep.subr.bf16.mxu0 %v1881_v50  ;;  %v914_v10 = vld [vmem:[%s1902_s22 + $0x30] sm:$0xff] }
  0x32   : > { %1409 = vmatprep.subr.bf16.mxu1 %v1701_v12  ;;  %v911_v12 = vld [vmem:[%s1902_s22 + $0x18] sm:$0xff] }
  0x34   : > { %1388 = vmatpush3.bf16.msra.mxu0 %v1888_v51 }
  0x35   : > { %1410 = vmatpush3.bf16.msra.mxu1 %v1713_v14  ;;  %1389 = vmatprep.subr.bf16.mxu0 %v1895_v52  ;;  %v448_v14 = vpack.c.bf16 %v442_v6, %v436_v4 }
  0x36   : > { %1411 = vmatprep.subr.bf16.mxu1 %v1726_v16  ;;  %v920_v16 = vpack.c.bf16 %v914_v10, %v908_v8 }
  0x38   : > { %1390 = vmatpush3.bf16.msra.mxu0 %v1907_v53 }
  0x39   : > { %1412 = vmatpush3.bf16.msra.mxu1 %v1738_v18  ;;  %1391 = vmatprep.subr.bf16.mxu0 %v1914_v54  ;;  %v917_v18 = vld [vmem:[%s1902_s22 + $0x48] sm:$0xff] }
  0x3a   : > { %1413 = vmatprep.subr.bf16.mxu1 %v1750_v20  ;;  %v913_v20 = vld [vmem:[%s1902_s22 + $0x28] sm:$0xff] }
  0x3c   : > { %1392 = vmatpush3.bf16.msra.mxu0 %v1547_v61 }
  0x3d   : > { %1414 = vmatpush3.bf16.msra.mxu1 %v1764_v22  ;;  %1393 = vmatprep.subr.bf16.mxu0 %v1548_v62  ;;  %v919_v22 = vld [vmem:[%s1902_s22 + $0x58] sm:$0xff] }
  0x3e   : > { %1415 = vmatprep.subr.bf16.mxu1 %v1776_v24  ;;  %v923_v24 = vpack.c.bf16 %v917_v18, %v911_v12 }
  0x40   : > { %1394 = vmatpush3.bf16.msra.mxu0 %v1549_v63 }
  0x41   : > { %1416 = vmatpush3.bf16.msra.mxu1 %v1789_v26  ;;  %1395 = vmatprep.subr.bf16.mxu0 %v1550_v0  ;;  %v925_v26 = vpack.c.bf16 %v919_v22, %v913_v20 }
  0x42   : > { %1417 = vmatprep.subr.bf16.mxu1 %v1801_v28 }
  0x44   : > { %1396 = vmatpush3.bf16.msra.mxu0 %v1551_v2 }
  0x45   : > { %1418 = vmatpush3.bf16.msra.mxu1 %v1820_v30  ;;  %1425 = vmatprep.subr.bf16.mxu0 %v1635_v1  ;;  %v910_v1 = vld [vmem:[%s1902_s22 + $0x10] sm:$0xff] }
  0x46   : > { %1447 = vmatprep.subr.bf16.mxu1 %v1842_v44  ;;  %v333_v44 = vld [vmem:[%s2025_s2] sm:$0xff] }
  0x47   : > { %853 = vmatmul.mubr.bf16.vlgmr.msra.gmra.mrb[4].mxu0 %v448_v14 }
  0x48   : > { %959 = vmatmul.mubr.bf16.vlgmr.msra.gmra.mrb[4].mxu1 %v920_v16  ;;  %1426 = vmatpush3.bf16.msra.mxu0 %v1647_v3  ;;  %v916_v3 = vld [vmem:[%s1902_s22 + $0x40] sm:$0xff] }
  0x49   : > { %1448 = vmatpush3.bf16.msra.mxu1 %v1847_v45  ;;  %1427 = vmatprep.subr.bf16.mxu0 %v1659_v5  ;;  %v912_v5 = vld [vmem:[%s1902_s22 + $0x20] sm:$0xff] }
  0x4a   : > { %1449 = vmatprep.subr.bf16.mxu1 %v1853_v46  ;;  %999 = vmatprep.mubr.bf16.mxu0 %v923_v24 }
  0x4b   : > { %1040 = vmatprep.mubr.bf16.mxu1 %v925_v26 }
  0x4c   : > { %1428 = vmatpush3.bf16.msra.mxu0 %v1671_v7  ;;  %v918_v7 = vld [vmem:[%s1902_s22 + $0x50] sm:$0xff] }
  0x4d   : > { %1450 = vmatpush3.bf16.msra.mxu1 %v1860_v47  ;;  %1429 = vmatprep.subr.bf16.mxu0 %v1683_v9  ;;  %v922_v9 = vpack.c.bf16 %v916_v3, %v910_v1 }
  0x4e   : > { %1451 = vmatprep.subr.bf16.mxu1 %v1867_v48 }
  0x50   : > { %1430 = vmatpush3.bf16.msra.mxu0 %v1695_v11  ;;  %v924_v11 = vpack.c.bf16 %v918_v7, %v912_v5 }
  0x51   : > { %1452 = vmatpush3.bf16.msra.mxu1 %v1874_v49  ;;  %1431 = vmatprep.subr.bf16.mxu0 %v1707_v13 }
  0x52   : > { %1453 = vmatprep.subr.bf16.mxu1 %v1881_v50 }
  0x54   : > { %1432 = vmatpush3.bf16.msra.mxu0 %v1720_v15 }
  0x55   : > { %1454 = vmatpush3.bf16.msra.mxu1 %v1888_v51  ;;  %1433 = vmatprep.subr.bf16.mxu0 %v1732_v17 }
  0x56   : > { %1455 = vmatprep.subr.bf16.mxu1 %v1895_v52 }
  0x58   : > { %1434 = vmatpush3.bf16.msra.mxu0 %v1744_v19 }
  0x59   : > { %1456 = vmatpush3.bf16.msra.mxu1 %v1907_v53  ;;  %1435 = vmatprep.subr.bf16.mxu0 %v1756_v21 }
  0x5a   : > { %1457 = vmatprep.subr.bf16.mxu1 %v1914_v54 }
  0x5c   : > { %1436 = vmatpush3.bf16.msra.mxu0 %v1770_v23 }
  0x5d   : > { %1458 = vmatpush3.bf16.msra.mxu1 %v1547_v61  ;;  %1437 = vmatprep.subr.bf16.mxu0 %v1782_v25 }
  0x5e   : > { %1459 = vmatprep.subr.bf16.mxu1 %v1548_v62 }
  0x60   : > { %1438 = vmatpush3.bf16.msra.mxu0 %v1795_v27 }
  0x61   : > { %1460 = vmatpush3.bf16.msra.mxu1 %v1549_v63  ;;  %1439 = vmatprep.subr.bf16.mxu0 %v1807_v29 }
  0x62   : > { %1461 = vmatprep.subr.bf16.mxu1 %v1550_v0 }
  0x64   : > { %1440 = vmatpush3.bf16.msra.mxu0 %v1826_v31 }
  0x65   : > { %1462 = vmatpush3.bf16.msra.mxu1 %v1551_v2 }
  0x67   : > { %1000 = vmatmul.mubr.bf16.vlgmr.msra.gmra.mrb[8].mxu0 %v922_v9 }
  0x68   : > { %1041 = vmatmul.mubr.bf16.vlgmr.msra.gmra.mrb[8].mxu1 %v924_v11 }
  0xfa   : > { %v1353_v13 = vpop.f32.mrb[0].mxu0 }
  0xfb   : > { %v1375_v15 = vpop.f32.mrb[0].mxu1  ;;  %v1354_v17 = vpop.f32.mrb[1].mxu0 }
  0xfc   : > { %v1355_v19 = vadd.f32 %v1354_v17, %v1353_v13  ;;  %v1376_v21 = vpop.f32.mrb[1].mxu1  ;;  %v1356_v23 = vpop.f32.mrb[2].mxu0 }
  0xfd   : > { %v1377_v25 = vadd.f32 %v1376_v21, %v1375_v15  ;;  %v1378_v27 = vpop.f32.mrb[2].mxu1  ;;  %v1357_v28 = vpop.f32.mrb[3].mxu0 }
  0xfe   : > { %v1358_v30 = vadd.f32 %v1357_v28, %v1356_v23  ;;  %v1379_v32 = vpop.f32.mrb[3].mxu1  ;;  %v1552_v23 = vld [vmem:[%s2029_s6] sm:$0xff]   ;;  %v1570_v28 = vmov 0.0  }
  0xff   : > { %v814_v29 = vadd.f32 %v1377_v25, %v1355_v19  ;;  %v1380_v33 = vadd.f32 %v1379_v32, %v1378_v27  ;;  %1475 = vmatprep.subr.bf16.mxu0 %v1570_v28  ;;  %1483 = vmatprep.subr.bf16.mxu1 %v1570_v28  ;;  %v1553_v32 = vld [vmem:[%s2029_s6 + $0x8] sm:$0xff]  }
 0x100   : > { %1476 = vmatpush3.bf16.msra.mxu0 %v1552_v23  ;;  %1484 = vmatpush3.bf16.msra.mxu1 %v1552_v23 }
 0x101   : > { %v817_v34 = vadd.f32 %v1380_v33, %v1358_v30  ;;  %1477 = vmatprep.subr.bf16.mxu0 %v1570_v28  ;;  %1479 = vmatprep.mubr.msk.bf16.mxu0 %vm1571_vm1, %v1570_v28 }
 0x102   : > { %1485 = vmatprep.subr.bf16.mxu1 %v1570_v28  ;;  %1487 = vmatprep.mubr.msk.bf16.mxu1 %vm1571_vm1, %v1570_v28 }
 0x104   : > { %1478 = vmatpush3.bf16.msra.mxu0 %v1553_v32  ;;  %1486 = vmatpush3.bf16.msra.mxu1 %v1553_v32 }
 0x11a   : > { %v1397_v35 = vpop.f32.mrb[4].mxu0 }
 0x11b   : > { %v1419_v36 = vpop.f32.mrb[4].mxu1  ;;  %v1398_v31 = vpop.f32.mrb[5].mxu0 }
 0x11c   : > { %v1420_v37 = vpop.f32.mrb[5].mxu1  ;;  %v1399_v38 = vadd.f32 %v1398_v31, %v1397_v35  ;;  %v1400_v40 = vpop.f32.mrb[6].mxu0 }
 0x11d   : > { %v1421_v39 = vadd.f32 %v1420_v37, %v1419_v36  ;;  %v1422_v41 = vpop.f32.mrb[6].mxu1  ;;  %v1401_v42 = vpop.f32.mrb[7].mxu0 }
 0x11e   : > { %v1423_v43 = vpop.f32.mrb[7].mxu1  ;;  %v855_v45 = vadd.f32 %v1399_v38, %v814_v29  ;;  %v1402_v46 = vadd.f32 %v1401_v42, %v1400_v40  ;;  %v1328_v40 = vld [vmem:[%s2027_s4] ss:$0 sm:$0xff] }
 0x11f   : > { %v1424_v47 = vadd.f32 %v1423_v43, %v1422_v41 }
 0x120   : > { %v858_v48 = vadd.f32 %v1402_v46, %v817_v34  ;;  %v861_v49 = vadd.f32 %v855_v45, %v333_v44 }
 0x122   : > { %v864_v50 = vsel %vm863_vm0, %v861_v49, 0.0  ;;  %v862_v51 = vadd.f32 %v858_v48, %v333_v44 }
 0x123   : > { %865 = vadd.xlane.f32.xlu0 %v864_v50 }
 0x124   : > { %v867_v52 = vsel %vm863_vm0, %v862_v51, 0.0 }
 0x127   : > { %868 = vadd.xlane.f32.xlu0 %v867_v52 }
 0x13a   : > { %v1441_v53 = vpop.f32.mrb[8].mxu0 }
 0x13b   : > { %v1463_v54 = vpop.f32.mrb[8].mxu1  ;;  %v1442_v55 = vpop.f32.mrb[9].mxu0 }
 0x13c   : > { %v1464_v56 = vpop.f32.mrb[9].mxu1  ;;  %v1443_v57 = vadd.f32 %v1442_v55, %v1441_v53  ;;  %v1444_v59 = vpop.f32.mrb[10].mxu0 }
 0x13d   : > { %v1465_v58 = vadd.f32 %v1464_v56, %v1463_v54  ;;  %v1466_v60 = vpop.f32.mrb[10].mxu1  ;;  %v1445_v61 = vpop.f32.mrb[11].mxu0 }
 0x13e   : > { %v1467_v62 = vpop.f32.mrb[11].mxu1  ;;  %v1002_v63 = vadd.f32 %v1443_v57, %v1421_v39  ;;  %v1446_v0 = vadd.f32 %v1445_v61, %v1444_v59 }
 0x13f   : > { %v1468_v2 = vadd.f32 %v1467_v62, %v1466_v60 }
 0x140   : > { %v1043_v4 = vadd.f32 %v1465_v58, %v1002_v63  ;;  %v1005_v6 = vadd.f32 %v1446_v0, %v1424_v47 }
 0x142   : > { %v1046_v8 = vadd.f32 %v1468_v2, %v1005_v6  ;;  %v1049_v10 = vadd.f32 %v1043_v4, %v333_v44 }
 0x144   : > { %v1051_v12 = vsel %vm863_vm0, %v1049_v10, 0.0  ;;  %v1050_v14 = vadd.f32 %v1046_v8, %v333_v44  ;;  %v1329_v44 = vld [vmem:[%s2028_s5] ss:$0 sm:$0xff] }
 0x145   : > { %1052 = vadd.xlane.f32.xlu1 %v1051_v12  ;;  %v1330_v8 = vld [vmem:[%s2030_s7] ss:$0 sm:$0xff] }
 0x146   : > { %v1054_v16 = vsel %vm863_vm0, %v1050_v14, 0.0 }
 0x149   : > { %1055 = vadd.xlane.f32.xlu1 %v1054_v16 }
 0x1b0   : > { %v866_v18 = vpop.xlane.xlu0 %865 }
 0x1b1   : > { %v871_v20 = vmul.f32 0.03125, %v866_v18 }
 0x1b3   : > { %v873_v22 = vsub.f32 %v861_v49, %v871_v20 }
 0x1b4   : > { %v869_v24 = vpop.xlane.xlu0 %868 }
 0x1b5   : > { %v872_v26 = vmul.f32 0.03125, %v869_v24  ;;  %v875_v1 = vmul.f32 %v873_v22, %v873_v22 }
 0x1b7   : > { %v874_v3 = vsub.f32 %v862_v51, %v872_v26  ;;  %v877_v5 = vsel %vm863_vm0, %v875_v1, 0.0 }
 0x1b8   : > { %878 = vadd.xlane.f32.xlu0 %v877_v5 }
 0x1b9   : > { %v876_v7 = vmul.f32 %v874_v3, %v874_v3 }
 0x1bb   : > { %v880_v9 = vsel %vm863_vm0, %v876_v7, 0.0 }
 0x1bc   : > { %881 = vadd.xlane.f32.xlu1 %v880_v9 }
 0x1d2   : > { %v1053_v11 = vpop.xlane.xlu1 %1052 }
 0x1d3   : > { %v1057_v13 = vmul.f32 0.03125, %v1053_v11 }
 0x1d5   : > { %v1059_v15 = vsub.f32 %v1049_v10, %v1057_v13 }
 0x1d6   : > { %v1056_v17 = vpop.xlane.xlu1 %1055 }
 0x1d7   : > { %v1058_v19 = vmul.f32 0.03125, %v1056_v17  ;;  %v1061_v21 = vmul.f32 %v1059_v15, %v1059_v15 }
 0x1d9   : > { %v1060_v25 = vsub.f32 %v1050_v14, %v1058_v19  ;;  %v1063_v27 = vsel %vm863_vm0, %v1061_v21, 0.0 }
 0x1da   : > { %1064 = vadd.xlane.f32.xlu0 %v1063_v27 }
 0x1db   : > { %v1062_v30 = vmul.f32 %v1060_v25, %v1060_v25 }
 0x1dd   : > { %v1066_v29 = vsel %vm863_vm0, %v1062_v30, 0.0 }
 0x1de   : > { %1067 = vadd.xlane.f32.xlu1 %v1066_v29 }
 0x245   : > { %v879_v33 = vpop.xlane.xlu0 %878 }
 0x246   : > { %v883_v34 = vmul.f32 0.03125, %v879_v33 }
 0x248   : > { %v885_v35 = vadd.f32 1e-06, %v883_v34 }
 0x249   : > { %v882_v36 = vpop.xlane.xlu1 %881 }
 0x24a   : > { %1554 = vrsqrt.f32 %v885_v35  ;;  %v884_v31 = vmul.f32 0.03125, %v882_v36 }
 0x24c   : > { %v886_v37 = vadd.f32 1e-06, %v884_v31 }
 0x24e   : > { %1556 = vrsqrt.f32 %v886_v37 }
 0x254   : > { %v1555_v38 = vpop.eup %1554 }
 0x255   : > { %v889_v39 = vmul.f32 %v1555_v38, %v873_v22 }
 0x257   : > { %v897_v42 = vmul.f32 %v1328_v40, %v889_v39 }
 0x258   : > { %v1557_v41 = vpop.eup %1556 }
 0x259   : > { %v890_v43 = vmul.f32 %v1557_v41, %v874_v3  ;;  %v905_v46 = vadd.f32 %v1329_v44, %v897_v42 }
 0x25b   : > { %v898_v45 = vmul.f32 %v1328_v40, %v890_v43 }
 0x25d   : > { %v906_v47 = vadd.f32 %v1329_v44, %v898_v45 }
 0x25f   : > { %v907_v48 = vpack.c.bf16 %v906_v47, %v905_v46 }
 0x261   : > { %1480 = vmatmul.mubr.msk.bf16.vlgmr.msra.gmra.mrb[12].mxu0 %vm863_vm0, %v907_v48 }
 0x267   : > { %v1065_v49 = vpop.xlane.xlu0 %1064 }
 0x268   : > { %v1069_v50 = vmul.f32 0.03125, %v1065_v49 }
 0x26a   : > { %v1071_v51 = vadd.f32 1e-06, %v1069_v50 }
 0x26b   : > { %v1068_v52 = vpop.xlane.xlu1 %1067 }
 0x26c   : > { %1558 = vrsqrt.f32 %v1071_v51  ;;  %v1070_v53 = vmul.f32 0.03125, %v1068_v52 }
 0x26e   : > { %v1072_v54 = vadd.f32 1e-06, %v1070_v53 }
 0x270   : > { %1560 = vrsqrt.f32 %v1072_v54 }
 0x276   : > { %v1559_v55 = vpop.eup %1558 }
 0x277   : > { %v1075_v56 = vmul.f32 %v1559_v55, %v1059_v15 }
 0x279   : > { %v1077_v58 = vmul.f32 %v1328_v40, %v1075_v56 }
 0x27a   : > { %v1561_v57 = vpop.eup %1560 }
 0x27b   : > { %v1076_v59 = vmul.f32 %v1561_v57, %v1060_v25  ;;  %v1079_v61 = vadd.f32 %v1329_v44, %v1077_v58 }
 0x27d   : > { %v1078_v60 = vmul.f32 %v1328_v40, %v1076_v59 }
 0x27f   : > { %v1080_v62 = vadd.f32 %v1329_v44, %v1078_v60 }
 0x281   : > { %v1081_v63 = vpack.c.bf16 %v1080_v62, %v1079_v61 }
 0x283   : > { %1488 = vmatmul.mubr.msk.bf16.vlgmr.msra.gmra.mrb[12].mxu1 %vm863_vm0, %v1081_v63 }
 0x334   : > { %v1142_v0 = vpop.f32.mrb[12].mxu0 }
 0x335   : > { %v1481_v2 = vpop.f32.mrb[13].mxu0  ;;  %v1143_v12 = vadd.f32 %v1330_v8, %v1142_v0 }
 0x336   : > { %v1145_v4 = vpop.f32.mrb[14].mxu0 }
 0x337   : > { %v1482_v6 = vpop.f32.mrb[15].mxu0  ;;  %v1146_v20 = vadd.f32 %v1330_v8, %v1145_v4 }
 0x356   : > { %v1186_v10 = vpop.f32.mrb[12].mxu1 }
 0x357   : > { %v1187_v14 = vadd.f32 %v1330_v8, %v1186_v10  ;;  %v1489_v16 = vpop.f32.mrb[13].mxu1 }
 0x358   : > { %v1189_v18 = vpop.f32.mrb[14].mxu1 }
 0x359   : > { %v1193_v22 = vsub.f32 %v1143_v12, %v1187_v14  ;;  %v1190_v24 = vadd.f32 %v1330_v8, %v1189_v18  ;;  %v1490_v26 = vpop.f32.mrb[15].mxu1 }
 0x35b   : > { %v1195_v1 = vmul.f32 %v1193_v22, %v1193_v22  ;;  %v1194_v3 = vsub.f32 %v1146_v20, %v1190_v24 }
 0x35d   : > { %v1196_v5 = vmul.f32 %v1194_v3, %v1194_v3  ;;  %v1197_v7 = vsel %vm863_vm0, %v1195_v1, 0.0 }
 0x35f   : > { %v1198_v9 = vsel %vm863_vm0, %v1196_v5, 0.0 }
 0x360   : > { %v1199_v11 = vadd.f32 %v1198_v9, %v1197_v7 }
 0x362   : > { %1200 = vadd.xlane.f32.xlu0 %v1199_v11 }
 0x3ef   : > { %v1201_v13 = vpop.xlane.xlu0 %1200 }
 0x3f0   : > { %v1202_v15 = vrot.slane %v1201_v13, 4 }
 0x3f2   : > { %v1203_v17 = vadd.f32 %v1202_v15, %v1201_v13 }
 0x3f4   : > { %v1204_v19 = vrot.slane %v1203_v17, 2 }
 0x3f6   : > { %v1205_v21 = vadd.f32 %v1204_v19, %v1203_v17 }
 0x3f8   : > { %v1206_v23 = vrot.slane %v1205_v21, 1 }
 0x3fa   : > { %v1207_v25 = vadd.f32 %v1206_v23, %v1205_v21 }
 0x3fc   : > { %1492 = vpush %v1207_v25 }
 0x42d   : > { %s1493_s10 = spop %1492 }
 0x42e   : > { %v1209_v27 = vstv %s1493_s10 }
 0x42f   : > { %1211 = vst.msk [vmem:[%s331_s9] sm:$0x1] %vm1210_vm2, %v1209_v27 }
 0x430 PF: > { %s18_s27 = sadd.s32 1, %s1568_s27  }
 0x431   : > { %p15_p5 = scmp.ge.s32.totalorder %s18_s27, 4  }
 0x433   :  { %17 = sbr.rel (!%p15_p5) target bundleno = 1 (0x1), region = 85 }

</bundles_post_ra>
